<compile_context>
chip_gen: v6e
topology: v6e:2x2x1
jax: 0.10.0
libtpu: 0.0.40
codegen_flags: <defaults>
</compile_context>

<pallas_src>
import jax
import jax.numpy as jnp
from jax.experimental import pallas as pl
from jax.experimental.pallas import tpu as pltpu

STEM_CIN = 3
STEM_COUT = 32        # inception Conv2d_1a_3x3 output channels
K = 3
STRIDE = 2
HIDDEN = 256
NUM_CLASSES = 2
OUT_PAD = 128         # pad final logits lane dim -> unmasked stores
IN_FEATURES = STEM_COUT  # real model: 2048 (see TODO above)


def _round_up(x, m):
    return ((x + m - 1) // m) * m


# ----------------------------- Pallas kernels ------------------------------

def _stem_kernel(lhs_ref, w_ref, shift_ref, mask_ref, o_ref, acc_ref):
    # lhs_ref: (RW, 48) bf16 tap-concatenated conv LHS for one row block of one image
    # w_ref:   (48, 32) bf16 tap-concatenated conv weights (BN scale folded in)
    # shift_ref: (1, 32) f32 folded-BN shift; mask_ref: (RW, 1) f32 pool mask * 1/(Ho*Wo)
    # o_ref:   (1, 32) f32 pooled output (written once per image)
    # acc_ref: (RW, 32) f32 VMEM pool accumulator
    n = pl.program_id(1)

    @pl.when(n == 0)
    def _():
        acc_ref[...] = jnp.zeros_like(acc_ref)

    r = jnp.dot(lhs_ref[...], w_ref[...], preferred_element_type=jnp.float32)
    r = jnp.maximum(r + shift_ref[...], 0.0)          # folded-BN shift + ReLU
    acc_ref[...] += r * mask_ref[...]                  # VPU accumulate of masked, pre-scaled rows

    @pl.when(n == pl.num_programs(1) - 1)
    def _():
        # single sublane (XLU) reduction per image -> (1, 32) pooled mean
        o_ref[...] = jnp.sum(acc_ref[...], axis=0, keepdims=True)


def _head_kernel(p_ref, w1_ref, b1_ref, w2_ref, b2_ref, w3_ref, b3_ref, o_ref):
    # (TB, C) pooled features -> Linear -> ReLU -> Linear -> ReLU -> Linear (lane-padded).
    # bf16 MXU operands, f32 accumulation / epilogue.
    h = jnp.dot(p_ref[...], w1_ref[...], preferred_element_type=jnp.float32) + b1_ref[...]
    h = jnp.maximum(h, 0.0).astype(jnp.bfloat16)
    h = jnp.dot(h, w2_ref[...], preferred_element_type=jnp.float32) + b2_ref[...]
    h = jnp.maximum(h, 0.0).astype(jnp.bfloat16)
    o_ref[...] = jnp.dot(h, w3_ref[...], preferred_element_type=jnp.float32) + b3_ref[...]


# ------------------------------ JAX wrappers -------------------------------

def conv_stem_pool(x_nchw, w_oikk, bn_scale, bn_shift):
    """Fused stem conv (stride 2, valid) + folded BN + ReLU + global average pool.

    Returns pooled features of shape (B, STEM_COUT), float32.
    """
    B, C, H, W = x_nchw.shape
    assert H % 2 == 0 and W % 2 == 0, "even spatial dims expected for space-to-depth"
    Hb, Wb = H // STRIDE, W // STRIDE
    Ho = (H - K) // STRIDE + 1          # = Hb - 1
    Wo = (W - K) // STRIDE + 1          # = Wb - 1
    C4 = 4 * C
    KC = 4 * C4                          # 48: tap-concatenated contraction dim
    n_out = Ho * Wb                      # flattened conv positions processed (incl. masked col)
    RW = min(512, _round_up(n_out, 16))  # output rows (M) per MXU dot
    NB = pl.cdiv(n_out, RW)
    n_pad = NB * RW
    n_src = n_pad + Wb + 1

    # Single fused wrapper layout pass: NHWC + 2x2 space-to-depth + row-flatten + tap-concat
    # along K + bf16 cast.  (Prebuilt here instead of in-kernel lane-concat of 12-wide slices.)
    x = jnp.transpose(x_nchw, (0, 2, 3, 1))                                   # NCHW -> NHWC
    xf = (x.reshape(B, Hb, 2, Wb, 2, C)
            .transpose(0, 1, 3, 2, 4, 5)                                      # (B,Hb,Wb,p,q,C)
            .reshape(B, Hb * Wb, C4))
    xf = jnp.pad(xf, ((0, 0), (0, n_src - Hb * Wb), (0, 0)))
    lhs = jnp.concatenate(
        [xf[:, 0:n_pad], xf[:, 1:n_pad + 1],
         xf[:, Wb:n_pad + Wb], xf[:, Wb + 1:n_pad + Wb + 1]],
        axis=-1).astype(jnp.bfloat16)                                          # (B, n_pad, 48)

    # Tap-concatenated conv weights (K=48) with BN scale folded into the output channels.
    # s2d channel order is (row-phase p, col-phase q, cin); tap (kh, kw) lands at block
    # offset (kh//2, kw//2), phase (kh%2, kw%2).  K order matches the lhs concat above:
    # t = 2*dh + dw for offsets {0, +1, +Wb, +Wb+1}.
    w6 = jnp.zeros((2, 2, 2, 2, C, STEM_COUT), jnp.float32)
    for kh in range(K):
        for kw in range(K):
            w6 = w6.at[kh // 2, kw // 2, kh % 2, kw % 2].set(w_oikk[:, :, kh, kw].T)
    w6 = w6 * bn_scale.reshape(1, 1, 1, 1, 1, STEM_COUT)
    w_cat = w6.reshape(KC, STEM_COUT).astype(jnp.bfloat16)

    shift = bn_shift.reshape(1, STEM_COUT).astype(jnp.float32)

    # Per-position pool mask pre-scaled by 1/(Ho*Wo): zero for the wrapped last s2d column
    # (ow == Wb-1), rows >= Ho, and zero padding.
    n_idx = jnp.arange(n_pad, dtype=jnp.int32)
    valid = ((n_idx % Wb) != (Wb - 1)) & (n_idx < Ho * Wb)
    pool_scale = (valid.astype(jnp.float32) / float(Ho * Wo)).reshape(n_pad, 1)

    pooled = pl.pallas_call(
        _stem_kernel,
        out_shape=jax.ShapeDtypeStruct((B, 1, STEM_COUT), jnp.float32),
        grid=(B, NB),
        in_specs=[
            pl.BlockSpec((None, RW, KC), lambda b, n: (b, n, 0)),
            pl.BlockSpec((KC, STEM_COUT), lambda b, n: (0, 0)),    # pinned -> DMA'd once
            pl.BlockSpec((1, STEM_COUT), lambda b, n: (0, 0)),
            pl.BlockSpec((RW, 1), lambda b, n: (n, 0)),
        ],
        out_specs=pl.BlockSpec((None, 1, STEM_COUT), lambda b, n: (b, 0, 0)),
        scratch_shapes=[pltpu.VMEM((RW, STEM_COUT), jnp.float32)],
        compiler_params=pltpu.CompilerParams(
            dimension_semantics=("parallel", "arbitrary")),
    )(lhs, w_cat, shift, pool_scale)
    return pooled.reshape(B, STEM_COUT)


def head(pooled, params):
    """Fused fc head, B-tiled: Linear->ReLU->Linear->ReLU->Linear (bf16 MXU operands)."""
    B, fin = pooled.shape
    w1, b1, w2, b2, w3, b3 = params
    w3p = jnp.pad(w3, ((0, 0), (0, OUT_PAD - NUM_CLASSES)))       # 128-lane unmasked store
    b3p = jnp.pad(b3.reshape(1, -1), ((0, 0), (0, OUT_PAD - NUM_CLASSES)))

    tb = min(128, _round_up(B, 8))                                # batch tile (megacore on v7x)
    bp = _round_up(B, tb)
    p_pad = jnp.pad(pooled, ((0, bp - B), (0, 0))).astype(jnp.bfloat16)

    out = pl.pallas_call(
        _head_kernel,
        out_shape=jax.ShapeDtypeStruct((bp, OUT_PAD), jnp.float32),
        grid=(bp // tb,),
        in_specs=[
            pl.BlockSpec((tb, fin), lambda i: (i, 0)),
            pl.BlockSpec((fin, HIDDEN), lambda i: (0, 0)),
            pl.BlockSpec((1, HIDDEN), lambda i: (0, 0)),
            pl.BlockSpec((HIDDEN, HIDDEN), lambda i: (0, 0)),
            pl.BlockSpec((1, HIDDEN), lambda i: (0, 0)),
            pl.BlockSpec((HIDDEN, OUT_PAD), lambda i: (0, 0)),
            pl.BlockSpec((1, OUT_PAD), lambda i: (0, 0)),
        ],
        out_specs=pl.BlockSpec((tb, OUT_PAD), lambda i: (i, 0)),
        compiler_params=pltpu.CompilerParams(dimension_semantics=("parallel",)),
    )(p_pad,
      w1.astype(jnp.bfloat16), b1.reshape(1, -1),
      w2.astype(jnp.bfloat16), b2.reshape(1, -1),
      w3p.astype(jnp.bfloat16), b3p)
    return out[:B, :NUM_CLASSES]


def stroke_model_forward(x_nchw, params):
    pooled = conv_stem_pool(x_nchw, params["stem_w"], params["bn_scale"], params["bn_shift"])
    # TODO(synk): remaining Inception-v3 mixed blocks would slot in between stem and pool here.
    logits = head(pooled, (params["w1"], params["b1"],
                           params["w2"], params["b2"],
                           params["w3"], params["b3"]))
    return logits   # matches `x[0] if isinstance(x, tuple) else x` — a single (B, 2) tensor


# ---------------------------- param construction ---------------------------

def init_params(key):
    ks = jax.random.split(key, 7)
    stem_w = jax.random.normal(ks[0], (STEM_COUT, STEM_CIN, K, K), jnp.float32) * 0.05
    w1_t = jax.random.normal(ks[1], (HIDDEN, IN_FEATURES), jnp.float32) * 0.05
    b1 = jax.random.normal(ks[2], (HIDDEN,), jnp.float32) * 0.01
    w2_t = jax.random.normal(ks[3], (HIDDEN, HIDDEN), jnp.float32) * 0.05
    b2 = jax.random.normal(ks[4], (HIDDEN,), jnp.float32) * 0.01
    w3_t = jax.random.normal(ks[5], (NUM_CLASSES, HIDDEN), jnp.float32) * 0.05
    b3 = jax.random.normal(ks[6], (NUM_CLASSES,), jnp.float32) * 0.01
    return {
        "stem_w": stem_w,
        "bn_scale": jnp.ones((STEM_COUT,), jnp.float32),   # folded BN (identity at init)
        "bn_shift": jnp.zeros((STEM_COUT,), jnp.float32),
        "w1": w1_t.T, "b1": b1,
        "w2": w2_t.T, "b2": b2,
        "w3": w3_t.T, "b3": b3,
    }


def reference_forward(x_nchw, p):
    """Plain-JAX f32 reference with identical math, for a correctness check."""
    x = jnp.transpose(x_nchw, (0, 2, 3, 1))
    B, H, W, C = x.shape
    Ho = (H - K) // STRIDE + 1
    Wo = (W - K) // STRIDE + 1
    cols = []
    for i in range(K):
        for j in range(K):
            cols.append(x[:, i:i + (Ho - 1) * STRIDE + 1:STRIDE,
                             j:j + (Wo - 1) * STRIDE + 1:STRIDE, :])
    patches = jnp.concatenate(cols, axis=-1).reshape(B * Ho * Wo, K * K * C)
    w_mat = jnp.transpose(p["stem_w"], (2, 3, 1, 0)).reshape(K * K * C, STEM_COUT)
    f = jnp.maximum(patches @ w_mat * p["bn_scale"] + p["bn_shift"], 0.0)
    pooled = f.reshape(B, Ho * Wo, STEM_COUT).mean(axis=1)
    h = jnp.maximum(pooled @ p["w1"] + p["b1"], 0.0)
    h = jnp.maximum(h @ p["w2"] + p["b2"], 0.0)
    return h @ p["w3"] + p["b3"]


if __name__ == "__main__":
    key = jax.random.PRNGKey(0)
    k_x, k_p = jax.random.split(key)
    x = jax.random.normal(k_x, (2, 3, 32, 32), jnp.float32)   # small NCHW image batch
    params = init_params(k_p)

    logits = stroke_model_forward(x, params)
    logits = jax.block_until_ready(logits)

    ref = reference_forward(x, params)
    assert logits.shape == (2, NUM_CLASSES)
    # bf16 MXU operands in stem + head (f32 accumulation/epilogue) -> loosened tolerance.
    assert jnp.allclose(logits, ref, atol=2e-2, rtol=2e-2), "Pallas output mismatch vs reference"
    print("KERNEL_OK")
</pallas_src>

<mosaic_0001>
module attributes {stable_mosaic.version = 11 : i64} {
  func.func @_stem_kernel(%arg0: i32, %arg1: i32, %arg2: memref<1x240x48xbf16, #tpu.memory_space<vmem>>, %arg3: memref<48x32xbf16, #tpu.memory_space<vmem>>, %arg4: memref<1x32xf32, #tpu.memory_space<vmem>>, %arg5: memref<240x1xf32, #tpu.memory_space<vmem>>, %arg6: memref<1x1x32xf32, #tpu.memory_space<vmem>>, %arg7: memref<240x32xf32, #tpu.memory_space<vmem>>) attributes {dimension_semantics = [#tpu.dimension_semantics<parallel>, #tpu.dimension_semantics<arbitrary>], iteration_bounds = array<i64: 2, 1>, scalar_prefetch = 0 : i64, scratch_operands = 1 : i64, tpu.core_type = #tpu.core_type<tc>, window_params = [{transform_indices = @transform_0, window_bounds = array<i64: 1, 240, 48>}, {pipeline_mode = #tpu.pipeline_mode<synchronous>, transform_indices = @transform_1, window_bounds = array<i64: 48, 32>}, {pipeline_mode = #tpu.pipeline_mode<synchronous>, transform_indices = @transform_2, window_bounds = array<i64: 1, 32>}, {transform_indices = @transform_3, window_bounds = array<i64: 240, 1>}, {transform_indices = @transform_4, window_bounds = array<i64: 1, 1, 32>}]} {
    %c0_i32 = arith.constant 0 : i32
    %0 = arith.cmpi eq, %arg1, %c0_i32 : i32
    %1 = arith.extui %0 : i1 to i32
    %c0_i32_0 = arith.constant 0 : i32
    %2 = arith.cmpi ne, %1, %c0_i32_0 : i32
    scf.if %2 {
      %cst_16 = arith.constant 0.000000e+00 : f32
      %21 = vector.broadcast %cst_16 : f32 to vector<240x32xf32>
      %c0_17 = arith.constant 0 : index
      %c0_18 = arith.constant 0 : index
      %22 = vector.load %arg7[%c0_17, %c0_18] : memref<240x32xf32, #tpu.memory_space<vmem>>, vector<240x32xf32>
      tpu.vector_store %arg7[%c0_17, %c0_18], %21 {strides = array<i32>} : memref<240x32xf32, #tpu.memory_space<vmem>>, vector<240x32xf32>,
    } else {
    }
    %c0 = arith.constant 0 : index
    %c0_1 = arith.constant 0 : index
    %c0_2 = arith.constant 0 : index
    %3 = vector.load %arg2[%c0, %c0_1, %c0_2] : memref<1x240x48xbf16, #tpu.memory_space<vmem>>, vector<1x240x48xbf16>
    %4 = vector.shape_cast %3 : vector<1x240x48xbf16> to vector<240x48xbf16>
    %c0_3 = arith.constant 0 : index
    %c0_4 = arith.constant 0 : index
    %5 = vector.load %arg3[%c0_3, %c0_4] : memref<48x32xbf16, #tpu.memory_space<vmem>>, vector<48x32xbf16>
    %cst = arith.constant dense<0.000000e+00> : vector<240x32xf32>
    %6 = tpu.matmul %4, %5, %cst {dimension_numbers = #tpu.dot_dimension_numbers<[1], [0], [0], [1], [0, 0, 1, 1], [], []>} : vector<240x48xbf16>, vector<48x32xbf16>, vector<240x32xf32> -> vector<240x32xf32>
    %c0_5 = arith.constant 0 : index
    %c0_6 = arith.constant 0 : index
    %7 = vector.load %arg4[%c0_5, %c0_6] : memref<1x32xf32, #tpu.memory_space<vmem>>, vector<1x32xf32>
    %8 = vector.broadcast %7 : vector<1x32xf32> to vector<240x32xf32>
    %9 = arith.addf %6, %8 : vector<240x32xf32>
    %cst_7 = arith.constant 0.000000e+00 : f32
    %10 = vector.broadcast %cst_7 : f32 to vector<240x32xf32>
    %11 = arith.maximumf %9, %10 : vector<240x32xf32>
    %c0_8 = arith.constant 0 : index
    %c0_9 = arith.constant 0 : index
    %12 = vector.load %arg7[%c0_8, %c0_9] : memref<240x32xf32, #tpu.memory_space<vmem>>, vector<240x32xf32>
    %c0_10 = arith.constant 0 : index
    %c0_11 = arith.constant 0 : index
    %13 = vector.load %arg5[%c0_10, %c0_11] : memref<240x1xf32, #tpu.memory_space<vmem>>, vector<240x1xf32>
    %14 = vector.broadcast %13 : vector<240x1xf32> to vector<240x32xf32>
    %15 = arith.mulf %11, %14 : vector<240x32xf32>
    %16 = arith.addf %12, %15 : vector<240x32xf32>
    %c0_12 = arith.constant 0 : index
    %c0_13 = arith.constant 0 : index
    %17 = vector.load %arg7[%c0_12, %c0_13] : memref<240x32xf32, #tpu.memory_space<vmem>>, vector<240x32xf32>
    tpu.vector_store %arg7[%c0_12, %c0_13], %16 {strides = array<i32>} : memref<240x32xf32, #tpu.memory_space<vmem>>, vector<240x32xf32>,
    %c0_i32_14 = arith.constant 0 : i32
    %18 = arith.cmpi eq, %arg1, %c0_i32_14 : i32
    %19 = arith.extui %18 : i1 to i32
    %c0_i32_15 = arith.constant 0 : i32
    %20 = arith.cmpi ne, %19, %c0_i32_15 : i32
    scf.if %20 {
      %c0_16 = arith.constant 0 : index
      %c0_17 = arith.constant 0 : index
      %21 = vector.load %arg7[%c0_16, %c0_17] : memref<240x32xf32, #tpu.memory_space<vmem>>, vector<240x32xf32>
      %cst_18 = arith.constant dense<0.000000e+00> : vector<32xf32>
      %22 = vector.multi_reduction <add>, %21, %cst_18 [0] : vector<240x32xf32> to vector<32xf32>
      %23 = vector.shape_cast %22 : vector<32xf32> to vector<1x32xf32>
      %c0_19 = arith.constant 0 : index
      %c0_20 = arith.constant 0 : index
      %c0_21 = arith.constant 0 : index
      %24 = vector.load %arg6[%c0_19, %c0_20, %c0_21] : memref<1x1x32xf32, #tpu.memory_space<vmem>>, vector<1x1x32xf32>
      %25 = vector.shape_cast %24 : vector<1x1x32xf32> to vector<1x32xf32>
      %26 = vector.shape_cast %23 : vector<1x32xf32> to vector<1x1x32xf32>
      tpu.vector_store %arg6[%c0_19, %c0_20, %c0_21], %26 {strides = array<i32>} : memref<1x1x32xf32, #tpu.memory_space<vmem>>, vector<1x1x32xf32>,
    } else {
    }
    return
  }
  func.func @transform_0(%arg0: i32, %arg1: i32) -> (i32, i32, i32) {
    %c0_i32 = arith.constant 0 : i32
    %c0_i32_0 = arith.constant 0 : i32
    return %arg0, %arg1, %c0_i32 : i32, i32, i32
  }
  func.func @transform_1(%arg0: i32, %arg1: i32) -> (i32, i32) {
    %c0_i32 = arith.constant 0 : i32
    %c0_i32_0 = arith.constant 0 : i32
    %c0_i32_1 = arith.constant 0 : i32
    return %c0_i32, %c0_i32_0 : i32, i32
  }
  func.func @transform_2(%arg0: i32, %arg1: i32) -> (i32, i32) {
    %c0_i32 = arith.constant 0 : i32
    %c0_i32_0 = arith.constant 0 : i32
    %c0_i32_1 = arith.constant 0 : i32
    return %c0_i32, %c0_i32_0 : i32, i32
  }
  func.func @transform_3(%arg0: i32, %arg1: i32) -> (i32, i32) {
    %c0_i32 = arith.constant 0 : i32
    %c0_i32_0 = arith.constant 0 : i32
    return %arg1, %c0_i32 : i32, i32
  }
  func.func @transform_4(%arg0: i32, %arg1: i32) -> (i32, i32, i32) {
    %c0_i32 = arith.constant 0 : i32
    %c0_i32_0 = arith.constant 0 : i32
    %c0_i32_1 = arith.constant 0 : i32
    return %arg0, %c0_i32, %c0_i32_0 : i32, i32, i32
  }
}

</mosaic_0001>

<bundles_post_ra>
// kernel: tpu_custom_call.1
= control target key start
LH: loop header
LB: loop body
LE: loop exit
PB: predicated region body
PF: predicated region fallthrough
CT: control target
= control target key end

     0   :  { %9 = vsyncpa [#allocation4], 0  ;;  %s1924_s0 = inlined_call_operand.vmem [shape: bf16[2,240,48], index: 0, kind: input, shape index: {}]   ;;  %s1925_s1 = inlined_call_operand.vmem [shape: bf16[48,32], index: 1, kind: input, shape index: {}]   ;;  %s1926_s2 = inlined_call_operand.vmem [shape: f32[1,32], index: 2, kind: input, shape index: {}]   ;;  %s1927_s3 = inlined_call_operand.vmem [shape: f32[240,1], index: 3, kind: input, shape index: {}]   ;;  %s1928_s4 = inlined_call_operand.hbm [shape: f32[2,1,32], index: 4, kind: output, shape index: {}]  }
   0x1   :  { %11 = vsyncpa [#allocation4 + $0x1], 0  ;;  %s1464_s15 = smov 0   ;;  %s1466_s16 = smov 0  }
   0x2   :  { %s1468_s17 = smov 0   ;;  %s1470_s18 = smov 0  }
   0x3   :  { %s1472_s19 = smov 0   ;;  %s1474_s20 = smov 0  }
   0x4 LB: > { %s1144_s21 = sadd.s32 4294967295, %s1433_s20   ;;  %s1145_s22 = sadd.s32 4294967294, %s1433_s20   ;;  %s1433_s20 = sphi %s1474_s20, %s17_s20   ;;  %s1429_s19 = sphi %s1472_s19, %s1935_s19   ;;  %s1425_s18 = sphi %s1470_s18, %s1934_s18   ;;  %s1421_s17 = sphi %s1468_s17, %s1933_s17   ;;  %s1417_s16 = sphi %s1466_s16, %s1932_s16   ;;  %s1413_s15 = sphi %s1464_s15, %s1931_s15  }
   0x5   : > { %s29_s23 = sadd.s32 1, %s1429_s19  ;;  %s132_s24 = sadd.s32 1, %s1421_s17 }
   0x6   : > { %p31_p0 = scmp.ge.s32.totalorder %s29_s23, 2  ;;  %p142_p1 = scmp.ne.s32.totalorder %s1421_s17, %s1417_s16 }
   0x7   : > { %p143_p2 = scmp.eq.s32.totalorder %s1144_s21, 1  ;;  %p148_p3 = scmp.ne.s32.totalorder %s1417_s16, %s1413_s15 }
   0x8   : > { %s1937_s23 = smov (%p31_p0, %s29_s23), 0  ;;  %p149_p5 = scmp.eq.s32.totalorder %s1145_s22, 1 }
   0x9   : > { %p1504_p4 = por %p143_p2, %p142_p1  ;;  %s129_s26 = ssub.s32 %s1429_s19, %s1937_s23 }
   0xa   : > { %p1149_p6 = scmp.ge.s32.totalorder %s1433_s20, 1  ;;  %p130_p7 = scmp.eq.s32.totalorder %s129_s26, 0 }
   0xb   : > { %p1511_p8 = por %p149_p5, %p148_p3  ;;  %p195_p9 = scmp.lt.s32.totalorder %s1433_s20, 3 }
   0xc   : > { %s1517_s28 = scalar_select %p130_p7, %s1421_s17, %s132_s24  }
   0xd   : > { %p196_p10 = pnand %p1149_p6, %p195_p9 }
   0xe   : > { %p230_p11 = scmp.lt.s32.totalorder (!%p196_p10), %s1425_s18, 1  ;;  %s1185_s21 = sshll.u32 (!%p196_p10), %s1425_s18, 4 }
   0xf   : > { %199 = sbr.rel (%p196_p10) target bundleno = 358 (0x166), region = 36  ;;  %s1058_s5 = scalar_lea.hbm (!%p196_p10), %s1928_s4, %s1185_s21 }
  0x10   : > { %s1438_s8 = smov (!%p196_p10), [#allocation3]  }
  0x11   : > { %s1361_s9 = sshll.u32 (!%p196_p10), %s1438_s8, 4  ;;  %s1362_s9 = int_to_ptr.vmem [resolvable:$false] %s1361_s9 }
  0x14   : > { %v1339_v0 = vld [vmem:[%s1925_s1 + $0x10] sm:$0xff]   ;;  %v1435_v1 = vmov 0.0   ;;  %v1340_v2 = vld [vmem:[%s1925_s1 + $0x8] sm:$0xff]   ;;  %vm1436_vm0 = vmmov 0   ;;  %s231_s7 = scalar_select %p230_p11, %s1425_s18, 1  ;;  %v1437_v3 = vmov 0  }
  0x15   : > { %1206 = vmatprep.subr.bf16.mxu0 %v1435_v1  ;;  %1272 = vmatprep.subr.bf16.mxu1 %v1435_v1  ;;  %v676_v4 = vld [vmem:[%s1927_s3] sm:$0xff]  ;;  %v678_v5 = vld [vmem:[%s1927_s3 + $0x10] sm:$0xff]  ;;  %v677_v7 = vld [vmem:[%s1927_s3 + $0x8] sm:$0xff]  ;;  %vm417_vm1 = vcmask 392192   ;;  %vm250_vm2 = vcmask 261120   ;;  %vm1045_vm3 = vcmask 253952  }
  0x16   : > { %1207 = vmatpush3.bf16.msra.mxu0 %v1339_v0  ;;  %1275 = vmatpush3.bf16.msra.mxu1 %v1339_v0  ;;  %v1341_v6 = vld [vmem:[%s1925_s1] sm:$0xff]   ;;  %s1278_s14 = smul.u32 120, %s231_s7  ;;  %v679_v8 = vld [vmem:[%s1927_s3 + $0x18] sm:$0xff]  ;;  %v681_v12 = vld [vmem:[%s1927_s3 + $0x28] sm:$0xff]  ;;  %251 = vst.msk [vmem:[#allocation2] sm:$0xff] %vm250_vm2, %v1435_v1  ;;  %s1363_s18 = scalar_lea.vmem %s1362_s9, 32 }
  0x17   : > { %1208 = vmatprep.subr.bf16.mxu0 %v1435_v1  ;;  %1273 = vmatprep.subr.bf16.mxu1 %v1435_v1  ;;  %v680_v11 = vld [vmem:[%s1927_s3 + $0x20] sm:$0xff]  ;;  %v682_v13 = vld [vmem:[%s1927_s3 + $0x30] sm:$0xff]  ;;  %v683_v14 = vld [vmem:[%s1927_s3 + $0x38] sm:$0xff]  ;;  %252 = vst.msk [vmem:[#allocation2 + $0x8] sm:$0xff] %vm250_vm2, %v1435_v1 }
  0x18   : > { %1212 = vmatprep.mubr.msk.bf16.mxu0 %vm1436_vm0, %v1435_v1  ;;  %1244 = vmatprep.mubr.msk.bf16.mxu1 %vm1436_vm0, %v1435_v1  ;;  %s1549_s24 = scalar_lea.vmem %s1924_s0, %s1278_s14  ;;  %v684_v17 = vld [vmem:[%s1927_s3 + $0x40] sm:$0xff]  ;;  %v685_v18 = vld [vmem:[%s1927_s3 + $0x48] sm:$0xff]  ;;  %v686_v19 = vld [vmem:[%s1927_s3 + $0x50] sm:$0xff]  ;;  %253 = vst.msk [vmem:[#allocation2 + $0x10] sm:$0xff] %vm250_vm2, %v1435_v1  ;;  %s227_s14 = sand.u32 1, %s1417_s16  }
  0x19   : > { %1337 = vset.pattern.permute.xlu0 %v1437_v3  ;;  %1338 = vset.pattern.permute.xlu1 %v1437_v3  ;;  %v1342_v9 = vld [vmem:[%s1549_s24] sm:$0xff]   ;;  %v1344_v15 = vld [vmem:[%s1549_s24 + $0x8] sm:$0xff]   ;;  %v1346_v20 = vld [vmem:[%s1549_s24 + $0x10] sm:$0xff]   ;;  %254 = vst.msk [vmem:[#allocation2 + $0x18] sm:$0xff] %vm250_vm2, %v1435_v1  ;;  %s228_s22 = scalar_lea.vmem [#allocation3], %s227_s14  ;;  %s1048_s6 = scalar_lea.sflag [#allocation4], %s227_s14 }
  0x1a   : > { %1209 = vmatpush3.bf16.msra.mxu0 %v1340_v2  ;;  %1276 = vmatpush3.bf16.msra.mxu1 %v1340_v2  ;;  %v1343_v10 = vld [vmem:[%s1549_s24 + $0x40] sm:$0xff]   ;;  %v1345_v16 = vld [vmem:[%s1549_s24 + $0x48] sm:$0xff]   ;;  %v1347_v21 = vld [vmem:[%s1549_s24 + $0x50] sm:$0xff]   ;;  %255 = vst.msk [vmem:[#allocation2 + $0x20] sm:$0xff] %vm250_vm2, %v1435_v1  ;;  %s1060_s26 = sshll.u32 %s228_s22, 4  ;;  %s1061_s26 = int_to_ptr.vmem [resolvable:$true] %s1060_s26 }
  0x1b   : > { %1210 = vmatprep.subr.bf16.mxu0 %v1435_v1  ;;  %1274 = vmatprep.subr.bf16.mxu1 %v1435_v1  ;;  %v687_v22 = vld [vmem:[%s1927_s3 + $0x58] sm:$0xff]  ;;  %256 = vst.msk [vmem:[#allocation2 + $0x28] sm:$0xff] %vm250_vm2, %v1435_v1  ;;  %257 = vst.msk [vmem:[#allocation2 + $0x30] sm:$0xff] %vm250_vm2, %v1435_v1  ;;  %v688_v23 = vld [vmem:[%s1927_s3 + $0x60] sm:$0xff]  ;;  %s1357_s7 = scalar_lea.vmem %s1061_s26, 16  ;;  %p1364_p1 = scmp.lt.s32.totalorder %s1061_s26, %s1362_s9 }
  0x1c   : > { %708 = vperm.xlu0 %1337, %v676_v4   ;;  %718 = vperm.xlu1 %1338, %v678_v5   ;;  %258 = vst.msk [vmem:[#allocation2 + $0x38] sm:$0xff] %vm250_vm2, %v1435_v1  ;;  %259 = vst.msk [vmem:[#allocation2 + $0x40] sm:$0xff] %vm250_vm2, %v1435_v1  ;;  %v689_v24 = vld [vmem:[%s1927_s3 + $0x68] sm:$0xff]  ;;  %v690_v25 = vld [vmem:[%s1927_s3 + $0x70] sm:$0xff]  ;;  %p1358_p12 = scmp.ne.s32.totalorder %s1061_s26, %s1357_s7  ;;  %p1365_p2 = scmp.lt.s32.totalorder %s1363_s18, %s1357_s7 }
  0x1d   : > { %260 = vst.msk [vmem:[#allocation2 + $0x48] sm:$0xff] %vm250_vm2, %v1435_v1  ;;  %261 = vst.msk [vmem:[#allocation2 + $0x50] sm:$0xff] %vm250_vm2, %v1435_v1  ;;  %v1348_v26 = vld [vmem:[%s1549_s24 + $0x18] sm:$0xff]   ;;  %v692_v29 = vld [vmem:[%s1927_s3 + $0x80] sm:$0xff] }
  0x1e   : > { %1211 = vmatpush3.bf16.msra.mxu0 %v1341_v6  ;;  %1277 = vmatpush3.bf16.msra.mxu1 %v1341_v6  ;;  %262 = vst.msk [vmem:[#allocation2 + $0x58] sm:$0xff] %vm250_vm2, %v1435_v1  ;;  %263 = vst.msk [vmem:[#allocation2 + $0x60] sm:$0xff] %vm250_vm2, %v1435_v1  ;;  %v1349_v27 = vld [vmem:[%s1549_s24 + $0x58] sm:$0xff]   ;;  %v693_v30 = vld [vmem:[%s1927_s3 + $0x88] sm:$0xff]  ;;  %p1359_p13 = pnand %p1358_p12, %p1504_p4  ;;  %p1366_p3 = por %p1365_p2, %p1364_p1 }
  0x1f   : > { %264 = vst.msk [vmem:[#allocation2 + $0x68] sm:$0xff] %vm250_vm2, %v1435_v1  ;;  %265 = vst.msk [vmem:[#allocation2 + $0x70] sm:$0xff] %vm250_vm2, %v1435_v1  ;;  %v691_v28 = vld [vmem:[%s1927_s3 + $0x78] sm:$0xff]  ;;  %v1350_v31 = vld [vmem:[%s1549_s24 + $0x20] sm:$0xff]  }
  0x20   : > { %713 = vperm.xlu0 %1337, %v677_v7   ;;  %723 = vperm.xlu1 %1338, %v679_v8   ;;  %266 = vst.msk [vmem:[#allocation2 + $0x78] sm:$0xff] %vm250_vm2, %v1435_v1  ;;  %267 = vst.msk [vmem:[#allocation2 + $0x80] sm:$0xff] %vm250_vm2, %v1435_v1  ;;  %v1351_v32 = vld [vmem:[%s1549_s24 + $0x60] sm:$0xff]   ;;  %v694_v33 = vld [vmem:[%s1927_s3 + $0x90] sm:$0xff]  ;;  %p1360_p0 = pneg %p1359_p13 }
  0x21   : > { %1213 = vmatmul.mubr.msk.bf16.vlgmr.msra.gmra.mxu0 %vm417_vm1, %v1342_v9  ;;  %1245 = vmatmul.mubr.msk.bf16.vlgmr.msra.gmra.mxu1 %vm417_vm1, %v1343_v10  ;;  %268 = vst.msk [vmem:[#allocation2 + $0x88] sm:$0xff] %vm250_vm2, %v1435_v1  ;;  %269 = vst.msk [vmem:[#allocation2 + $0x90] sm:$0xff] %vm250_vm2, %v1435_v1  ;;  %v695_v34 = vld [vmem:[%s1927_s3 + $0x98] sm:$0xff]  ;;  %v696_v35 = vld [vmem:[%s1927_s3 + $0xa0] sm:$0xff] }
  0x22   : > { %1216 = vmatprep.mubr.msk.bf16.mxu0 %vm1436_vm0, %v1435_v1  ;;  %1248 = vmatprep.mubr.msk.bf16.mxu1 %vm1436_vm0, %v1435_v1  ;;  %270 = vst.msk [vmem:[#allocation2 + $0x98] sm:$0xff] %vm250_vm2, %v1435_v1  ;;  %271 = vst.msk [vmem:[#allocation2 + $0xa0] sm:$0xff] %vm250_vm2, %v1435_v1  ;;  %v697_v36 = vld [vmem:[%s1927_s3 + $0xa8] sm:$0xff]  ;;  %v698_v39 = vld [vmem:[%s1927_s3 + $0xb0] sm:$0xff]  ;;  %p1367_p5 = pnand %p1366_p3, %p1360_p0 }
  0x23   : > { %272 = vst.msk [vmem:[#allocation2 + $0xa8] sm:$0xff] %vm250_vm2, %v1435_v1  ;;  %273 = vst.msk [vmem:[#allocation2 + $0xb0] sm:$0xff] %vm250_vm2, %v1435_v1  ;;  %v1352_v37 = vld [vmem:[%s1549_s24 + $0x28] sm:$0xff]   ;;  %v699_v40 = vld [vmem:[%s1927_s3 + $0xb8] sm:$0xff] }
  0x24   : > { %728 = vperm.xlu0 %1337, %v680_v11   ;;  %733 = vperm.xlu1 %1338, %v681_v12   ;;  %274 = vst.msk [vmem:[#allocation2 + $0xb8] sm:$0xff] %vm250_vm2, %v1435_v1  ;;  %275 = vst.msk [vmem:[#allocation2 + $0xc0] sm:$0xff] %vm250_vm2, %v1435_v1  ;;  %v1353_v38 = vld [vmem:[%s1549_s24 + $0x68] sm:$0xff]   ;;  %v700_v41 = vld [vmem:[%s1927_s3 + $0xc0] sm:$0xff] }
  0x25   : > { %276 = vst.msk [vmem:[#allocation2 + $0xc8] sm:$0xff] %vm250_vm2, %v1435_v1  ;;  %277 = vst.msk [vmem:[#allocation2 + $0xd0] sm:$0xff] %vm250_vm2, %v1435_v1  ;;  %v701_v42 = vld [vmem:[%s1927_s3 + $0xc8] sm:$0xff]  ;;  %v1354_v43 = vld [vmem:[%s1549_s24 + $0x30] sm:$0xff]  }
  0x26   : > { %278 = vst.msk [vmem:[#allocation2 + $0xd8] sm:$0xff] %vm250_vm2, %v1435_v1  ;;  %279 = vst.msk [vmem:[#allocation2 + $0xe0] sm:$0xff] %vm250_vm2, %v1435_v1  ;;  %v1355_v44 = vld [vmem:[%s1549_s24 + $0x70] sm:$0xff]   ;;  %v703_v46 = vld [vmem:[%s1927_s3 + $0xd8] sm:$0xff] }
  0x27   : > { %280 = vst.msk [vmem:[#allocation2 + $0xe8] sm:$0xff] %vm250_vm2, %v1435_v1  ;;  %v702_v45 = vld [vmem:[%s1927_s3 + $0xd0] sm:$0xff]  ;;  %v704_v47 = vld [vmem:[%s1927_s3 + $0xe0] sm:$0xff]  ;;  %v705_v48 = vld [vmem:[%s1927_s3 + $0xe8] sm:$0xff] }
  0x28   : > { %738 = vperm.xlu0 %1337, %v682_v13   ;;  %743 = vperm.xlu1 %1338, %v683_v14   ;;  %v1356_v49 = vld [vmem:[%s1549_s24 + $0x38] sm:$0xff]   ;;  %v646_v12 = vld [vmem:[#allocation2] sm:$0xff] }
  0x29   : > { %1217 = vmatmul.mubr.msk.bf16.gmra.mxu0 %vm417_vm1, %v1344_v15  ;;  %1249 = vmatmul.mubr.msk.bf16.gmra.mxu1 %vm417_vm1, %v1345_v16  ;;  %v662_v15 = vld [vmem:[#allocation2 + $0x80] sm:$0xff] }
  0x2a   : > { %1220 = vmatprep.mubr.msk.bf16.mxu0 %vm1436_vm0, %v1435_v1  ;;  %1252 = vmatprep.mubr.msk.bf16.mxu1 %vm1436_vm0, %v1435_v1 }
  0x2c   : > { %748 = vperm.xlu0 %1337, %v684_v17   ;;  %753 = vperm.xlu1 %1338, %v685_v18  }
  0x30   : > { %758 = vperm.xlu0 %1337, %v686_v19   ;;  %763 = vperm.xlu1 %1338, %v687_v22  }
  0x31   : > { %1221 = vmatmul.mubr.msk.bf16.gmra.mxu0 %vm417_vm1, %v1346_v20  ;;  %1253 = vmatmul.mubr.msk.bf16.gmra.mxu1 %vm417_vm1, %v1347_v21 }
  0x32   : > { %1224 = vmatprep.mubr.msk.bf16.mxu0 %vm1436_vm0, %v1435_v1  ;;  %1256 = vmatprep.mubr.msk.bf16.mxu1 %vm1436_vm0, %v1435_v1 }
  0x34   : > { %768 = vperm.xlu0 %1337, %v688_v23   ;;  %773 = vperm.xlu1 %1338, %v689_v24  }
  0x38   : > { %778 = vperm.xlu0 %1337, %v690_v25   ;;  %783 = vperm.xlu1 %1338, %v691_v28  }
  0x39   : > { %1225 = vmatmul.mubr.msk.bf16.gmra.mxu0 %vm417_vm1, %v1348_v26  ;;  %1257 = vmatmul.mubr.msk.bf16.gmra.mxu1 %vm417_vm1, %v1349_v27  ;;  %v647_v27 = vld [vmem:[#allocation2 + $0x8] sm:$0xff] }
  0x3a   : > { %1228 = vmatprep.mubr.msk.bf16.mxu0 %vm1436_vm0, %v1435_v1  ;;  %1260 = vmatprep.mubr.msk.bf16.mxu1 %vm1436_vm0, %v1435_v1 }
  0x3c   : > { %788 = vperm.xlu0 %1337, %v692_v29   ;;  %793 = vperm.xlu1 %1338, %v693_v30   ;;  %v663_v30 = vld [vmem:[#allocation2 + $0x88] sm:$0xff] }
  0x40   : > { %798 = vperm.xlu0 %1337, %v694_v33   ;;  %803 = vperm.xlu1 %1338, %v695_v34  }
  0x41   : > { %1229 = vmatmul.mubr.msk.bf16.gmra.mxu0 %vm417_vm1, %v1350_v31  ;;  %1261 = vmatmul.mubr.msk.bf16.gmra.mxu1 %vm417_vm1, %v1351_v32 }
  0x42   : > { %1232 = vmatprep.mubr.msk.bf16.mxu0 %vm1436_vm0, %v1435_v1  ;;  %1264 = vmatprep.mubr.msk.bf16.mxu1 %vm1436_vm0, %v1435_v1 }
  0x44   : > { %808 = vperm.xlu0 %1337, %v696_v35   ;;  %813 = vperm.xlu1 %1338, %v697_v36  }
  0x48   : > { %818 = vperm.xlu0 %1337, %v698_v39   ;;  %823 = vperm.xlu1 %1338, %v699_v40  }
  0x49   : > { %1233 = vmatmul.mubr.msk.bf16.gmra.mxu0 %vm417_vm1, %v1352_v37  ;;  %1265 = vmatmul.mubr.msk.bf16.gmra.mxu1 %vm417_vm1, %v1353_v38 }
  0x4a   : > { %1236 = vmatprep.mubr.msk.bf16.mxu0 %vm1436_vm0, %v1435_v1  ;;  %1268 = vmatprep.mubr.msk.bf16.mxu1 %vm1436_vm0, %v1435_v1 }
  0x4c   : > { %828 = vperm.xlu0 %1337, %v700_v41   ;;  %833 = vperm.xlu1 %1338, %v701_v42   ;;  %v648_v42 = vld [vmem:[#allocation2 + $0x10] sm:$0xff] }
  0x50   : > { %838 = vperm.xlu0 %1337, %v702_v45   ;;  %843 = vperm.xlu1 %1338, %v703_v46  }
  0x51   : > { %1237 = vmatmul.mubr.msk.bf16.gmra.mxu0 %vm417_vm1, %v1354_v43  ;;  %1269 = vmatmul.mubr.msk.bf16.gmra.mxu1 %vm417_vm1, %v1355_v44  ;;  %v664_v43 = vld [vmem:[#allocation2 + $0x90] sm:$0xff] }
  0x52   : > { %1240 = vmatprep.mubr.msk.bf16.mxu0 %vm1436_vm0, %v1435_v1  ;;  %v1778_v1 = vld [vmem:[%s1926_s2] ss:$0 sm:$0xff] }
  0x54   : > { %848 = vperm.xlu0 %1337, %v704_v47   ;;  %853 = vperm.xlu1 %1338, %v705_v48  }
  0x59   : > { %1241 = vmatmul.mubr.msk.bf16.gmra.mxu0 %vm417_vm1, %v1356_v49 }
  0x97   : > { %v709_v50 = vpop.permute.xlu0 %708  ;;  %v719_v51 = vpop.permute.xlu1 %718 }
  0x9b   : > { %v714_v52 = vpop.permute.xlu0 %713  ;;  %v1751_v53 = vpop.permute.xlu1 %723 }
  0x9f   : > { %v1753_v54 = vpop.permute.xlu0 %728  ;;  %v1755_v55 = vpop.permute.xlu1 %733 }
  0xa3   : > { %v1757_v56 = vpop.permute.xlu0 %738  ;;  %v1759_v57 = vpop.permute.xlu1 %743 }
  0xa7   : > { %v1761_v58 = vpop.permute.xlu0 %748  ;;  %v1763_v59 = vpop.permute.xlu1 %753 }
  0xab   : > { %v1765_v60 = vpop.permute.xlu0 %758  ;;  %v1767_v61 = vpop.permute.xlu1 %763 }
  0xaf   : > { %v1769_v62 = vpop.permute.xlu0 %768  ;;  %v1771_v63 = vpop.permute.xlu1 %773 }
  0xb3   : > { %v1773_v0 = vpop.permute.xlu0 %778  ;;  %v1782_v6 = vpop.permute.xlu1 %783 }
  0xb7   : > { %v789_v11 = vpop.permute.xlu0 %788  ;;  %v794_v26 = vpop.permute.xlu1 %793 }
  0xbb   : > { %v799_v41 = vpop.permute.xlu0 %798 }
  0xe1   : > { %v497_v2 = vpop.f32.mrf.mxu0  ;;  %v561_v3 = vpop.f32.mrf.mxu1 }
  0xe2   : > { %v498_v4 = vadd.f32 %v1778_v1, %v497_v2  ;;  %v562_v5 = vadd.f32 %v1778_v1, %v561_v3 }
  0xe3   : > { %v1214_v7 = vpop.f32.mrf.mxu0  ;;  %v1246_v8 = vpop.f32.mrf.mxu1 }
  0xe4   : > { %v616_v9 = vmax.f32 %v498_v4, 0.0  ;;  %v632_v10 = vmax.f32 %v562_v5, 0.0  ;;  %v804_v7 = vpop.permute.xlu1 %803  ;;  %v649_v8 = vld [vmem:[#allocation2 + $0x18] sm:$0xff] }
  0xe5   : > { %v500_v13 = vpop.f32.mrf.mxu0  ;;  %v564_v14 = vpop.f32.mrf.mxu1 }
  0xe6   : > { %v856_v16 = vmul.f32 %v709_v50, %v616_v9  ;;  %v501_v17 = vadd.f32 %v1778_v1, %v500_v13  ;;  %v565_v18 = vadd.f32 %v1778_v1, %v564_v14  ;;  %v872_v19 = vmul.f32 %v789_v11, %v632_v10  ;;  %v665_v9 = vld [vmem:[#allocation2 + $0x98] sm:$0xff] }
  0xe7   : > { %v1215_v20 = vpop.f32.mrf.mxu0  ;;  %v1247_v21 = vpop.f32.mrf.mxu1 }
  0xe8   : > { %v886_v22 = vadd.f32 %v856_v16, %v646_v12  ;;  %v617_v23 = vmax.f32 %v501_v17, 0.0  ;;  %v633_v24 = vmax.f32 %v565_v18, 0.0  ;;  %v902_v25 = vadd.f32 %v872_v19, %v662_v15 }
  0xe9   : > { %v505_v28 = vpop.f32.mrf.mxu0  ;;  %v569_v29 = vpop.f32.mrf.mxu1 }
  0xea   : > { %917 = vst.msk [vmem:[#allocation2] sm:$0xff] %vm250_vm2, %v886_v22  ;;  %v857_v31 = vmul.f32 %v714_v52, %v617_v23  ;;  %933 = vst.msk [vmem:[#allocation2 + $0x80] sm:$0xff] %vm250_vm2, %v902_v25  ;;  %v506_v32 = vadd.f32 %v1778_v1, %v505_v28  ;;  %v570_v33 = vadd.f32 %v1778_v1, %v569_v29  ;;  %v809_v23 = vpop.permute.xlu0 %808 }
  0xeb   : > { %v873_v34 = vmul.f32 %v794_v26, %v633_v24  ;;  %v1218_v35 = vpop.f32.mrf.mxu0  ;;  %v1250_v36 = vpop.f32.mrf.mxu1  ;;  %v650_v24 = vld [vmem:[#allocation2 + $0x20] sm:$0xff] }
  0xec   : > { %v887_v37 = vadd.f32 %v857_v31, %v647_v27  ;;  %v618_v38 = vmax.f32 %v506_v32, 0.0  ;;  %v634_v39 = vmax.f32 %v570_v33, 0.0  ;;  %v814_v31 = vpop.permute.xlu1 %813  ;;  %v651_v36 = vld [vmem:[#allocation2 + $0x28] sm:$0xff] }
  0xed   : > { %v903_v40 = vadd.f32 %v873_v34, %v663_v30  ;;  %v508_v44 = vpop.f32.mrf.mxu0  ;;  %v572_v45 = vpop.f32.mrf.mxu1 }
  0xee   : > { %918 = vst.msk [vmem:[#allocation2 + $0x8] sm:$0xff] %vm250_vm2, %v887_v37  ;;  %v858_v46 = vmul.f32 %v719_v51, %v618_v38  ;;  %v874_v47 = vmul.f32 %v799_v41, %v634_v39  ;;  %v509_v48 = vadd.f32 %v1778_v1, %v508_v44  ;;  %v573_v49 = vadd.f32 %v1778_v1, %v572_v45  ;;  %v667_v37 = vld [vmem:[#allocation2 + $0xa8] sm:$0xff] }
  0xef   : > { %934 = vst.msk [vmem:[#allocation2 + $0x88] sm:$0xff] %vm250_vm2, %v903_v40  ;;  %v1219_v50 = vpop.f32.mrf.mxu0  ;;  %v1251_v52 = vpop.f32.mrf.mxu1 }
  0xf0   : > { %v888_v2 = vadd.f32 %v858_v46, %v648_v42  ;;  %v904_v3 = vadd.f32 %v874_v47, %v664_v43  ;;  %v619_v4 = vmax.f32 %v509_v48, 0.0  ;;  %v635_v5 = vmax.f32 %v573_v49, 0.0  ;;  %v652_v48 = vld [vmem:[#allocation2 + $0x30] sm:$0xff] }
  0xf1   : > { %v513_v10 = vpop.f32.mrf.mxu0  ;;  %v577_v11 = vpop.f32.mrf.mxu1 }
  0xf2   : > { %919 = vst.msk [vmem:[#allocation2 + $0x10] sm:$0xff] %vm250_vm2, %v888_v2  ;;  %935 = vst.msk [vmem:[#allocation2 + $0x90] sm:$0xff] %vm250_vm2, %v904_v3  ;;  %v859_v51 = vmul.f32 %v1751_v53, %v619_v4  ;;  %v875_v12 = vmul.f32 %v804_v7, %v635_v5  ;;  %v514_v13 = vadd.f32 %v1778_v1, %v513_v10  ;;  %v666_v53 = vld [vmem:[#allocation2 + $0xa0] sm:$0xff]  ;;  %v819_v2 = vpop.permute.xlu0 %818  ;;  %v668_v3 = vld [vmem:[#allocation2 + $0xb0] sm:$0xff]  ;;  %v824_v10 = vpop.permute.xlu1 %823 }
  0xf3   : > { %v578_v14 = vadd.f32 %v1778_v1, %v577_v11  ;;  %v1222_v15 = vpop.f32.mrf.mxu0  ;;  %v1254_v16 = vpop.f32.mrf.mxu1 }
  0xf4   : > { %v889_v17 = vadd.f32 %v859_v51, %v649_v8  ;;  %v905_v18 = vadd.f32 %v875_v12, %v665_v9  ;;  %v620_v19 = vmax.f32 %v514_v13, 0.0  ;;  %v669_v15 = vld [vmem:[#allocation2 + $0xb8] sm:$0xff] }
  0xf5   : > { %v636_v20 = vmax.f32 %v578_v14, 0.0  ;;  %v516_v21 = vpop.f32.mrf.mxu0  ;;  %v580_v22 = vpop.f32.mrf.mxu1  ;;  %v653_v14 = vld [vmem:[#allocation2 + $0x38] sm:$0xff] }
  0xf6   : > { %920 = vst.msk [vmem:[#allocation2 + $0x18] sm:$0xff] %vm250_vm2, %v889_v17  ;;  %936 = vst.msk [vmem:[#allocation2 + $0x98] sm:$0xff] %vm250_vm2, %v905_v18  ;;  %v517_v25 = vadd.f32 %v1778_v1, %v516_v21  ;;  %v581_v26 = vadd.f32 %v1778_v1, %v580_v22  ;;  %v860_v27 = vmul.f32 %v1753_v54, %v620_v19 }
  0xf7   : > { %v876_v28 = vmul.f32 %v809_v23, %v636_v20  ;;  %v1223_v29 = vpop.f32.mrf.mxu0  ;;  %v1255_v30 = vpop.f32.mrf.mxu1 }
  0xf8   : > { %v621_v32 = vmax.f32 %v517_v25, 0.0  ;;  %v637_v33 = vmax.f32 %v581_v26, 0.0  ;;  %v890_v34 = vadd.f32 %v860_v27, %v650_v24  ;;  %v654_v25 = vld [vmem:[#allocation2 + $0x40] sm:$0xff]  ;;  %v829_v29 = vpop.permute.xlu0 %828 }
  0xf9   : > { %v906_v35 = vadd.f32 %v876_v28, %v666_v53  ;;  %v521_v38 = vpop.f32.mrf.mxu0  ;;  %v585_v39 = vpop.f32.mrf.mxu1  ;;  %v670_v30 = vld [vmem:[#allocation2 + $0xc0] sm:$0xff] }
  0xfa   : > { %v861_v40 = vmul.f32 %v1755_v55, %v621_v32  ;;  %v877_v41 = vmul.f32 %v814_v31, %v637_v33  ;;  %v522_v42 = vadd.f32 %v1778_v1, %v521_v38  ;;  %921 = vst.msk [vmem:[#allocation2 + $0x20] sm:$0xff] %vm250_vm2, %v890_v34  ;;  %v586_v54 = vadd.f32 %v1778_v1, %v585_v39 }
  0xfb   : > { %937 = vst.msk [vmem:[#allocation2 + $0xa0] sm:$0xff] %vm250_vm2, %v906_v35  ;;  %v1226_v43 = vpop.f32.mrf.mxu0  ;;  %v1258_v44 = vpop.f32.mrf.mxu1 }
  0xfc   : > { %v891_v45 = vadd.f32 %v861_v40, %v651_v36  ;;  %v907_v46 = vadd.f32 %v877_v41, %v667_v37  ;;  %v622_v47 = vmax.f32 %v522_v42, 0.0  ;;  %v638_v49 = vmax.f32 %v586_v54, 0.0  ;;  %v834_v36 = vpop.permute.xlu1 %833  ;;  %v655_v41 = vld [vmem:[#allocation2 + $0x48] sm:$0xff] }
  0xfd   : > { %v524_v50 = vpop.f32.mrf.mxu0  ;;  %v588_v52 = vpop.f32.mrf.mxu1  ;;  %v671_v42 = vld [vmem:[#allocation2 + $0xc8] sm:$0xff] }
  0xfe   : > { %922 = vst.msk [vmem:[#allocation2 + $0x28] sm:$0xff] %vm250_vm2, %v891_v45  ;;  %938 = vst.msk [vmem:[#allocation2 + $0xa8] sm:$0xff] %vm250_vm2, %v907_v46  ;;  %v862_v55 = vmul.f32 %v1757_v56, %v622_v47  ;;  %v525_v4 = vadd.f32 %v1778_v1, %v524_v50  ;;  %v589_v5 = vadd.f32 %v1778_v1, %v588_v52 }
  0xff   : > { %v878_v7 = vmul.f32 %v819_v2, %v638_v49  ;;  %v1227_v8 = vpop.f32.mrf.mxu0  ;;  %v1259_v9 = vpop.f32.mrf.mxu1  ;;  %v951_v2 = vld [vmem:[#allocation2 + $0x8] sm:$0xff] }
 0x100   : > { %v892_v11 = vadd.f32 %v862_v55, %v652_v48  ;;  %v623_v51 = vmax.f32 %v525_v4, 0.0  ;;  %v639_v12 = vmax.f32 %v589_v5, 0.0  ;;  %v656_v55 = vld [vmem:[#allocation2 + $0x50] sm:$0xff]  ;;  %v839_v8 = vpop.permute.xlu0 %838 }
 0x101   : > { %v908_v13 = vadd.f32 %v878_v7, %v668_v3  ;;  %v529_v16 = vpop.f32.mrf.mxu0  ;;  %v593_v17 = vpop.f32.mrf.mxu1  ;;  %v950_v7 = vld [vmem:[#allocation2] sm:$0xff]  ;;  %v672_v9 = vld [vmem:[#allocation2 + $0xd0] sm:$0xff] }
 0x102   : > { %923 = vst.msk [vmem:[#allocation2 + $0x30] sm:$0xff] %vm250_vm2, %v892_v11  ;;  %v863_v56 = vmul.f32 %v1759_v57, %v623_v51  ;;  %v879_v18 = vmul.f32 %v824_v10, %v639_v12  ;;  %v530_v19 = vadd.f32 %v1778_v1, %v529_v16  ;;  %v594_v20 = vadd.f32 %v1778_v1, %v593_v17  ;;  %v952_v51 = vld [vmem:[#allocation2 + $0x10] sm:$0xff]  ;;  %v844_v16 = vpop.permute.xlu1 %843 }
 0x103   : > { %939 = vst.msk [vmem:[#allocation2 + $0xb0] sm:$0xff] %vm250_vm2, %v908_v13  ;;  %v1230_v21 = vpop.f32.mrf.mxu0  ;;  %v1262_v22 = vpop.f32.mrf.mxu1 }
 0x104   : > { %v893_v23 = vadd.f32 %v863_v56, %v653_v14  ;;  %v909_v24 = vadd.f32 %v879_v18, %v669_v15  ;;  %v624_v53 = vmax.f32 %v530_v19, 0.0  ;;  %v640_v26 = vmax.f32 %v594_v20, 0.0  ;;  %v953_v20 = vld [vmem:[#allocation2 + $0x18] sm:$0xff] }
 0x105   : > { %v532_v27 = vpop.f32.mrf.mxu0  ;;  %v596_v28 = vpop.f32.mrf.mxu1  ;;  %v981_v15 = vsel %vm250_vm2, %v951_v2, 0.0  ;;  %v980_v19 = vsel %vm250_vm2, %v950_v7, 0.0  ;;  %v673_v22 = vld [vmem:[#allocation2 + $0xd8] sm:$0xff] }
 0x106   : > { %924 = vst.msk [vmem:[#allocation2 + $0x38] sm:$0xff] %vm250_vm2, %v893_v23  ;;  %940 = vst.msk [vmem:[#allocation2 + $0xb8] sm:$0xff] %vm250_vm2, %v909_v24  ;;  %v864_v57 = vmul.f32 %v1761_v58, %v624_v53  ;;  %v533_v31 = vadd.f32 %v1778_v1, %v532_v27  ;;  %v597_v32 = vadd.f32 %v1778_v1, %v596_v28  ;;  %v983_v53 = vsel %vm250_vm2, %v952_v51, 0.0 }
 0x107   : > { %v880_v33 = vmul.f32 %v829_v29, %v640_v26  ;;  %v1231_v34 = vpop.f32.mrf.mxu0  ;;  %v1263_v35 = vpop.f32.mrf.mxu1  ;;  %v982_v28 = vadd.f32 %v981_v15, %v980_v19  ;;  %v954_v29 = vld [vmem:[#allocation2 + $0x20] sm:$0xff] }
 0x108   : > { %v894_v37 = vadd.f32 %v864_v57, %v654_v25  ;;  %v625_v38 = vmax.f32 %v533_v31, 0.0  ;;  %v641_v39 = vmax.f32 %v597_v32, 0.0  ;;  %v985_v32 = vsel %vm250_vm2, %v953_v20, 0.0  ;;  %v660_v20 = vld [vmem:[#allocation2 + $0x70] sm:$0xff] }
 0x109   : > { %v910_v40 = vadd.f32 %v880_v33, %v670_v30  ;;  %v537_v54 = vpop.f32.mrf.mxu0  ;;  %v601_v43 = vpop.f32.mrf.mxu1 }
 0x10a   : > { %925 = vst.msk [vmem:[#allocation2 + $0x40] sm:$0xff] %vm250_vm2, %v894_v37  ;;  %v865_v58 = vmul.f32 %v1763_v59, %v625_v38  ;;  %v881_v44 = vmul.f32 %v834_v36, %v641_v39  ;;  %v538_v45 = vadd.f32 %v1778_v1, %v537_v54  ;;  %v602_v46 = vadd.f32 %v1778_v1, %v601_v43  ;;  %v955_v37 = vld [vmem:[#allocation2 + $0x28] sm:$0xff]  ;;  %v658_v38 = vld [vmem:[#allocation2 + $0x60] sm:$0xff] }
 0x10b   : > { %941 = vst.msk [vmem:[#allocation2 + $0xc0] sm:$0xff] %vm250_vm2, %v910_v40  ;;  %v1234_v47 = vpop.f32.mrf.mxu0  ;;  %v1266_v48 = vpop.f32.mrf.mxu1  ;;  %v984_v36 = vadd.f32 %v983_v53, %v982_v28  ;;  %v674_v43 = vld [vmem:[#allocation2 + $0xe0] sm:$0xff] }
 0x10c   : > { %v895_v49 = vadd.f32 %v865_v58, %v655_v41  ;;  %v911_v50 = vadd.f32 %v881_v44, %v671_v42  ;;  %v626_v52 = vmax.f32 %v538_v45, 0.0  ;;  %v642_v3 = vmax.f32 %v602_v46, 0.0  ;;  %v849_v42 = vpop.permute.xlu0 %848  ;;  %v956_v46 = vld [vmem:[#allocation2 + $0x30] sm:$0xff] }
 0x10d   : > { %v540_v4 = vpop.f32.mrf.mxu0  ;;  %v604_v5 = vpop.f32.mrf.mxu1  ;;  %v987_v41 = vsel %vm250_vm2, %v954_v29, 0.0  ;;  %v986_v45 = vadd.f32 %v985_v32, %v984_v36 }
 0x10e   : > { %926 = vst.msk [vmem:[#allocation2 + $0x48] sm:$0xff] %vm250_vm2, %v895_v49  ;;  %942 = vst.msk [vmem:[#allocation2 + $0xc8] sm:$0xff] %vm250_vm2, %v911_v50  ;;  %v866_v59 = vmul.f32 %v1765_v60, %v626_v52  ;;  %v541_v10 = vadd.f32 %v1778_v1, %v540_v4  ;;  %v605_v11 = vadd.f32 %v1778_v1, %v604_v5  ;;  %v657_v60 = vld [vmem:[#allocation2 + $0x58] sm:$0xff]  ;;  %v989_v50 = vsel %vm250_vm2, %v955_v37, 0.0  ;;  %v854_v5 = vpop.permute.xlu1 %853 }
 0x10f   : > { %v882_v12 = vmul.f32 %v839_v8, %v642_v3  ;;  %v1235_v13 = vpop.f32.mrf.mxu0  ;;  %v1267_v14 = vpop.f32.mrf.mxu1  ;;  %v988_v3 = vadd.f32 %v987_v41, %v986_v45  ;;  %v957_v4 = vld [vmem:[#allocation2 + $0x38] sm:$0xff]  ;;  %v675_v8 = vld [vmem:[#allocation2 + $0xe8] sm:$0xff] }
 0x110   : > { %v896_v17 = vadd.f32 %v866_v59, %v656_v55  ;;  %v627_v56 = vmax.f32 %v541_v10, 0.0  ;;  %v643_v18 = vmax.f32 %v605_v11, 0.0  ;;  %v993_v15 = vsel %vm250_vm2, %v957_v4, 0.0  ;;  %v971_v4 = vld [vmem:[#allocation2 + $0xa8] sm:$0xff] }
 0x111   : > { %v912_v21 = vadd.f32 %v882_v12, %v672_v9  ;;  %v545_v23 = vpop.f32.mrf.mxu0  ;;  %v609_v24 = vpop.f32.mrf.mxu1  ;;  %v991_v9 = vsel %vm250_vm2, %v956_v46, 0.0  ;;  %v990_v12 = vadd.f32 %v989_v50, %v988_v3  ;;  %v958_v13 = vld [vmem:[#allocation2 + $0x40] sm:$0xff]  ;;  %v968_v46 = vld [vmem:[#allocation2 + $0x90] sm:$0xff] }
 0x112   : > { %927 = vst.msk [vmem:[#allocation2 + $0x50] sm:$0xff] %vm250_vm2, %v896_v17  ;;  %v867_v25 = vmul.f32 %v1767_v61, %v627_v56  ;;  %v883_v26 = vmul.f32 %v844_v16, %v643_v18  ;;  %v546_v27 = vadd.f32 %v1778_v1, %v545_v23  ;;  %v610_v57 = vadd.f32 %v1778_v1, %v609_v24 }
 0x113   : > { %943 = vst.msk [vmem:[#allocation2 + $0xd0] sm:$0xff] %vm250_vm2, %v912_v21  ;;  %v1238_v30 = vpop.f32.mrf.mxu0  ;;  %v1270_v31 = vpop.f32.mrf.mxu1  ;;  %v992_v18 = vadd.f32 %v991_v9, %v990_v12  ;;  %v973_v9 = vld [vmem:[#allocation2 + $0xb8] sm:$0xff] }
 0x114   : > { %v897_v33 = vadd.f32 %v867_v25, %v657_v60  ;;  %v913_v34 = vadd.f32 %v883_v26, %v673_v22  ;;  %v628_v35 = vmax.f32 %v546_v27, 0.0  ;;  %v644_v61 = vmax.f32 %v610_v57, 0.0  ;;  %v661_v57 = vld [vmem:[#allocation2 + $0x78] sm:$0xff] }
 0x115   : > { %v548_v39 = vpop.f32.mrf.mxu0  ;;  %v612_v40 = vpop.f32.mrf.mxu1  ;;  %v959_v19 = vld [vmem:[#allocation2 + $0x48] sm:$0xff]  ;;  %v995_v60 = vsel %vm250_vm2, %v958_v13, 0.0  ;;  %v994_v23 = vadd.f32 %v993_v15, %v992_v18  ;;  %v1025_v13 = vsel %vm250_vm2, %v973_v9, 0.0 }
 0x116   : > { %928 = vst.msk [vmem:[#allocation2 + $0x58] sm:$0xff] %vm250_vm2, %v897_v33  ;;  %944 = vst.msk [vmem:[#allocation2 + $0xd8] sm:$0xff] %vm250_vm2, %v913_v34  ;;  %v868_v54 = vmul.f32 %v1769_v62, %v628_v35  ;;  %v549_v58 = vadd.f32 %v1778_v1, %v548_v39  ;;  %v613_v44 = vadd.f32 %v1778_v1, %v612_v40  ;;  %v659_v62 = vld [vmem:[#allocation2 + $0x68] sm:$0xff]  ;;  %v997_v25 = vsel %vm250_vm2, %v959_v19, 0.0 }
 0x117   : > { %v884_v47 = vmul.f32 %v849_v42, %v644_v61  ;;  %v1239_v48 = vpop.f32.mrf.mxu0  ;;  %v1271_v49 = vpop.f32.mrf.mxu1  ;;  %v996_v28 = vadd.f32 %v995_v60, %v994_v23 }
 0x118   : > { %v898_v52 = vadd.f32 %v868_v54, %v658_v38  ;;  %v629_v2 = vmax.f32 %v549_v58, 0.0  ;;  %v645_v55 = vmax.f32 %v613_v44, 0.0  ;;  %v967_v58 = vld [vmem:[#allocation2 + $0x88] sm:$0xff]  ;;  %v969_v49 = vld [vmem:[#allocation2 + $0x98] sm:$0xff] }
 0x119   : > { %v914_v7 = vadd.f32 %v884_v47, %v674_v43  ;;  %v553_v59 = vpop.f32.mrf.mxu0  ;;  %v960_v24 = vld [vmem:[#allocation2 + $0x50] sm:$0xff]  ;;  %v998_v32 = vadd.f32 %v997_v25, %v996_v28  ;;  %v1013_v48 = vsel %vm250_vm2, %v967_v58, 0.0  ;;  %v1017_v3 = vsel %vm250_vm2, %v969_v49, 0.0 }
 0x11a   : > { %929 = vst.msk [vmem:[#allocation2 + $0x60] sm:$0xff] %vm250_vm2, %v898_v52  ;;  %v869_v10 = vmul.f32 %v1771_v63, %v629_v2  ;;  %v885_v11 = vmul.f32 %v854_v5, %v645_v55  ;;  %v554_v51 = vadd.f32 %v1778_v1, %v553_v59  ;;  %v999_v30 = vsel %vm250_vm2, %v960_v24, 0.0  ;;  %v970_v2 = vld [vmem:[#allocation2 + $0xa0] sm:$0xff] }
 0x11b   : > { %945 = vst.msk [vmem:[#allocation2 + $0xe0] sm:$0xff] %vm250_vm2, %v914_v7  ;;  %v1242_v14 = vpop.f32.mrf.mxu0  ;;  %v1000_v34 = vadd.f32 %v999_v30, %v998_v32  ;;  %v1015_v52 = vsel %vm250_vm2, %v968_v46, 0.0  ;;  %v1019_v7 = vsel %vm250_vm2, %v970_v2, 0.0  ;;  %v1021_v59 = vsel %vm250_vm2, %v971_v4, 0.0 }
 0x11c   : > { %v899_v16 = vadd.f32 %v869_v10, %v659_v62  ;;  %v915_v17 = vadd.f32 %v885_v11, %v675_v8  ;;  %v630_v56 = vmax.f32 %v554_v51, 0.0  ;;  %v972_v62 = vld [vmem:[#allocation2 + $0xb0] sm:$0xff]  ;;  %v974_v51 = vld [vmem:[#allocation2 + $0xc0] sm:$0xff]  ;;  %v975_v14 = vld [vmem:[#allocation2 + $0xc8] sm:$0xff] }
 0x11d   : > { %v556_v21 = vpop.f32.mrf.mxu0  ;;  %v961_v29 = vld [vmem:[#allocation2 + $0x58] sm:$0xff]  ;;  %v1023_v11 = vsel %vm250_vm2, %v972_v62, 0.0  ;;  %v1029_v18 = vsel %vm250_vm2, %v975_v14, 0.0 }
 0x11e   : > { %930 = vst.msk [vmem:[#allocation2 + $0x68] sm:$0xff] %vm250_vm2, %v899_v16  ;;  %946 = vst.msk [vmem:[#allocation2 + $0xe8] sm:$0xff] %vm250_vm2, %v915_v17  ;;  %v870_v63 = vmul.f32 %v1773_v0, %v630_v56  ;;  %v557_v22 = vadd.f32 %v1778_v1, %v556_v21  ;;  %v1001_v1 = vsel %vm250_vm2, %v961_v29, 0.0  ;;  %v1027_v16 = vsel %vm250_vm2, %v974_v51, 0.0  ;;  %v976_v17 = vld [vmem:[#allocation2 + $0xd0] sm:$0xff]  ;;  %v977_v19 = vld [vmem:[#allocation2 + $0xd8] sm:$0xff] }
 0x11f   : > { %v1243_v53 = vpop.f32.mrf.mxu0  ;;  %v1002_v37 = vadd.f32 %v1001_v1, %v1000_v34  ;;  %v1031_v21 = vsel %vm250_vm2, %v976_v17, 0.0 }
 0x120   : > { %v900_v26 = vadd.f32 %v870_v63, %v660_v20  ;;  %v631_v27 = vmax.f32 %v557_v22, 0.0  ;;  %v1033_v22 = vsel %vm250_vm2, %v977_v19, 0.0 }
 0x121   : > { %v962_v0 = vld [vmem:[#allocation2 + $0x60] sm:$0xff] }
 0x122   : > { %931 = vst.msk [vmem:[#allocation2 + $0x70] sm:$0xff] %vm250_vm2, %v900_v26  ;;  %v871_v31 = vmul.f32 %v1782_v6, %v631_v27  ;;  %v1003_v36 = vsel %vm250_vm2, %v962_v0, 0.0  ;;  %v966_v6 = vld [vmem:[#allocation2 + $0x80] sm:$0xff] }
 0x123   : > { %v1004_v61 = vadd.f32 %v1003_v36, %v1002_v37  ;;  %v1011_v45 = vsel %vm250_vm2, %v966_v6, 0.0  ;;  %v978_v60 = vld [vmem:[#allocation2 + $0xe0] sm:$0xff] }
 0x124   : > { %v901_v33 = vadd.f32 %v871_v31, %v661_v57  ;;  %v1035_v53 = vsel %vm250_vm2, %v978_v60, 0.0 }
 0x125   : > { %v963_v35 = vld [vmem:[#allocation2 + $0x68] sm:$0xff] }
 0x126   : > { %932 = vst.msk [vmem:[#allocation2 + $0x78] sm:$0xff] %vm250_vm2, %v901_v33  ;;  %v1005_v38 = vsel %vm250_vm2, %v963_v35, 0.0  ;;  %v979_v23 = vld [vmem:[#allocation2 + $0xe8] sm:$0xff] }
 0x127   : > { %v1006_v41 = vadd.f32 %v1005_v38, %v1004_v61  ;;  %v1037_v26 = vsel %vm250_vm2, %v979_v23, 0.0 }
 0x129   : > { %v964_v39 = vld [vmem:[#allocation2 + $0x70] sm:$0xff] }
 0x12a   : > { %v1007_v40 = vsel %vm250_vm2, %v964_v39, 0.0 }
 0x12b   : > { %v1008_v54 = vadd.f32 %v1007_v40, %v1006_v41 }
 0x12d   : > { %v965_v42 = vld [vmem:[#allocation2 + $0x78] sm:$0xff] }
 0x12e   : > { %v1009_v43 = vsel %vm250_vm2, %v965_v42, 0.0 }
 0x12f   : > { %v1010_v44 = vadd.f32 %v1009_v43, %v1008_v54 }
 0x131   : > { %v1012_v47 = vadd.f32 %v1011_v45, %v1010_v44 }
 0x133   : > { %v1014_v50 = vadd.f32 %v1013_v48, %v1012_v47 }
 0x135   : > { %v1016_v55 = vadd.f32 %v1015_v52, %v1014_v50 }
 0x137   : > { %v1018_v5 = vadd.f32 %v1017_v3, %v1016_v55 }
 0x139   : > { %v1020_v8 = vadd.f32 %v1019_v7, %v1018_v5 }
 0x13b   : > { %v1022_v10 = vadd.f32 %v1021_v59, %v1020_v8 }
 0x13d   : > { %v1024_v12 = vadd.f32 %v1023_v11, %v1022_v10 }
 0x13f   : > { %v1026_v15 = vadd.f32 %v1025_v13, %v1024_v12 }
 0x141   : > { %v1028_v56 = vadd.f32 %v1027_v16, %v1026_v15 }
 0x143   : > { %v1030_v20 = vadd.f32 %v1029_v18, %v1028_v56 }
 0x145   : > { %v1032_v63 = vadd.f32 %v1031_v21, %v1030_v20 }
 0x147   : > { %v1034_v24 = vadd.f32 %v1033_v22, %v1032_v63 }
 0x149   : > { %v1036_v25 = vadd.f32 %v1035_v53, %v1034_v24 }
 0x14b   : > { %v1038_v27 = vadd.f32 %v1037_v26, %v1036_v25 }
 0x14d   : > { %v1039_v28 = vrot.slane %v1038_v27, 4 }
 0x14f   : > { %v1040_v29 = vadd.f32 %v1039_v28, %v1038_v27 }
 0x151   : > { %v1041_v57 = vrot.slane %v1040_v29, 2 }
 0x153   : > { %v1042_v30 = vadd.f32 %v1041_v57, %v1040_v29 }
 0x155   : > { %v1043_v31 = vrot.slane %v1042_v30, 1 }
 0x157   : > { %v1044_v32 = vadd.f32 %v1043_v31, %v1042_v30 }
 0x159   : > { %1046 = vst.msk [vmem:[%s228_s22] sm:$0x1] %vm1045_vm3, %v1044_v32 }
 0x15a   : > { %1370 = shalt.err (!%p1367_p5)
}
 0x15b   : > { %s1371_s10 = scalar_lea.hbm %s1058_s5, 16  ;;  %s1375_s24 = scalar_lea.hbm %s1928_s4, 32 }
 0x15c   : > { %p1372_p6 = scmp.ne.s32.totalorder %s1058_s5, %s1371_s10  ;;  %p1376_p10 = scmp.lt.s32.totalorder %s1058_s5, %s1928_s4 }
 0x15d   : > { %p1377_p11 = scmp.lt.s32.totalorder %s1375_s24, %s1371_s10 }
 0x15e   : > { %p1373_p7 = pnand %p1372_p6, %p1504_p4 }
 0x15f   : > { %p1378_p12 = por %p1377_p11, %p1376_p10 }
 0x160   : > { %p1374_p9 = pneg %p1373_p7 }
 0x162   : > { %p1379_p13 = pnand %p1378_p12, %p1374_p9 }
 0x164   : > { %1382 = shalt.err (!%p1379_p13)
}
 0x165   : > { %1279 = dma.vmem_to_hbm [thread:$0]  (%p1504_p4), %s1061_s26, 16, %s1058_s5, %s1048_s6  }
 0x166 PF: > { %p1285_p0 = scmp.ge.s32.totalorder %s1433_s20, 2  ;;  %s1072_s21 = sand.u32 1, %s1413_s15  }
 0x167   : > { %s1073_s22 = scalar_lea.sflag [#allocation4], %s1072_s21 }
 0x168   : > { %p1282_p1 = pnand %p1285_p0, %p1511_p8 }
 0x16a   : > { %p1283_p2 = pneg %p1282_p1 }
 0x16c   : > { %1408 = dma.done.wait (%p1283_p2), %s1073_s22, 16  }
 0x16d   : > { %1410 = vsyncadd (%p1283_p2), %s1073_s22, 4294967280  ;;  %s17_s20 = sadd.s32 1, %s1433_s20   ;;  %s1931_s15 = smov %s1417_s16 }
 0x16e   : > { %p14_p3 = scmp.ge.s32.totalorder %s17_s20, 4   ;;  %s1932_s16 = smov %s1421_s17 }
 0x16f   : > { %s1933_s17 = smov %s1517_s28  ;;  %s1934_s18 = smov %s1429_s19 }
 0x170   : > { %s1935_s19 = smov %s1937_s23  ;;  %16 = sbr.rel (!%p14_p3) target bundleno = 4 (0x4), region = 82 }
 0x175   :  { %1077 = vsyncpa [#allocation4], 1 }
 0x176   :  { %1079 = vsyncpa [#allocation4 + $0x1], 1 }

</bundles_post_ra>
